<compile_context>
chip_gen: v7x
topology: tpu7x:2x2x1
jax: 0.10.0
libtpu: 0.0.40
codegen_flags: <defaults>
</compile_context>

<pallas_src>
import jax
import jax.numpy as jnp
from jax.experimental import pallas as pl
from jax.experimental.pallas import tpu as pltpu


_SQRT_2_OVER_PI = 0.7978845608028654  # sqrt(2/pi)
_ROW_QUANTUM = 32                     # sublane-safe row multiple for f32/bf16/int8
_VMEM_LIMIT_BYTES = 48 * 1024 * 1024  # explicit scoped-VMEM limit (fits v7x 64 MiB)


def _gelu_kernel(x_ref, o_ref):
    # f32 internal math; cast back on the store. Free for a mem-bound kernel and
    # correct on every generation (v5e lacks bf16 VPU/EUP). tanh goes to the EUP
    # slot, so the VALU is nowhere near the bottleneck.
    x = x_ref[...].astype(jnp.float32)
    c = jnp.float32(_SQRT_2_OVER_PI)
    inner = c * (x + jnp.float32(0.044715) * (x * x * x))
    y = jnp.float32(0.5) * x * (jnp.float32(1.0) + jnp.tanh(inner))
    o_ref[...] = y.astype(o_ref.dtype)


def _pick_tile_rows(rows, lane, target_block_bytes):
    """Row-block size: ~target bytes of f32 working set, quantum-aligned, and
    capped so the grid has >= 4 steps when the input permits (v7x megacore
    sharding + DMA/compute overlap)."""
    if rows <= _ROW_QUANTUM:
        return rows  # tiny input: one full block (full second-minor dim is legal)
    # Size by the f32 working set (4 bytes/elem), independent of the input dtype.
    target_rows = max(
        _ROW_QUANTUM,
        (target_block_bytes // (lane * 4)) // _ROW_QUANTUM * _ROW_QUANTUM,
    )
    # Cap so cdiv(rows, tile) >= want_steps (prefer 4 steps, fewer only if rows
    # don't allow quantum-aligned tiles for that many steps).
    want_steps = min(4, rows // _ROW_QUANTUM)
    cap = max(
        _ROW_QUANTUM,
        pl.cdiv(rows, want_steps) // _ROW_QUANTUM * _ROW_QUANTUM,
    )
    return min(target_rows, cap, rows)


def _gelu_2d(x2, tile_r):
    rows, lane = x2.shape
    grid = (pl.cdiv(rows, tile_r),)  # ragged last row-block handled by Pallas masking
    return pl.pallas_call(
        _gelu_kernel,
        out_shape=jax.ShapeDtypeStruct((rows, lane), x2.dtype),
        grid_spec=pl.GridSpec(
            grid=grid,
            in_specs=[pl.BlockSpec((tile_r, lane), lambda i: (i, 0))],
            out_specs=pl.BlockSpec((tile_r, lane), lambda i: (i, 0)),
        ),
        compiler_params=pltpu.CompilerParams(
            # "parallel" only matters on v7x (2 TCs); harmless elsewhere.
            dimension_semantics=("parallel",),
            vmem_limit_bytes=_VMEM_LIMIT_BYTES,
        ),
    )(x2)


def gelu(x, *, target_block_bytes=4 * 1024 * 1024):
    orig_shape = x.shape
    if x.size == 0:
        return x

    n = x.size
    lane = None
    for cand in (2048, 1024, 512, 256, 128):
        if n % cand == 0 and n >= cand:
            lane = cand
            break

    if lane is not None:
        # Lane-dense fast path: flatten -> (rows, LANE). Pure reshape, no pad,
        # no trailing slice, single HBM pass inside the pallas_call.
        rows = n // lane
        x2 = x.reshape(rows, lane)
        tile_r = _pick_tile_rows(rows, lane, target_block_bytes)
        return _gelu_2d(x2, tile_r).reshape(orig_shape)

    # Ragged path (element count not a multiple of 128): keep the trailing dim
    # whole (full last dim is a legal block shape) and tile over the collapsed
    # leading dims. Still exactly one pass over HBM — no pad / slice copies.
    if x.ndim >= 2:
        rows = 1
        for d in orig_shape[:-1]:
            rows *= d
        cols = orig_shape[-1]
    else:
        rows, cols = 1, n
    x2 = x.reshape(rows, cols)
    tile_r = _pick_tile_rows(rows, cols, target_block_bytes)
    return _gelu_2d(x2, tile_r).reshape(orig_shape)


def _gelu_ref(x):
    # Pure-JAX reference mirroring the PyTorch module exactly (f32 math).
    xf = x.astype(jnp.float32)
    y = 0.5 * xf * (1.0 + jnp.tanh(jnp.sqrt(2.0 / jnp.pi) * (xf + 0.044715 * xf**3)))
    return y.astype(x.dtype)


if __name__ == "__main__":
    key = jax.random.PRNGKey(0)

    # 1) Shape implied by the module's typical use: (batch, seq, hidden).
    x = jax.random.normal(key, (2, 8, 32), dtype=jnp.float32)
    y = gelu(x)
    jax.block_until_ready(y)
    y_ref = _gelu_ref(x)
    assert y.shape == x.shape and y.dtype == x.dtype
    assert jnp.allclose(y, y_ref, atol=1e-5, rtol=1e-5)

    # 2) Multi-block path (grid >= 4, lane-dense 2048-wide reshape).
    k2 = jax.random.PRNGKey(0)
    x_big = jax.random.normal(k2, (64, 128, 128), dtype=jnp.float32)
    y_big = gelu(x_big)
    jax.block_until_ready(y_big)
    assert jnp.allclose(y_big, _gelu_ref(x_big), atol=1e-5, rtol=1e-5)

    # 3) Ragged path (495 elements, bf16): single pass, no pad/slice copies.
    k3 = jax.random.PRNGKey(0)
    x_bf = jax.random.normal(k3, (3, 5, 33), dtype=jnp.bfloat16)
    y_bf = gelu(x_bf)
    jax.block_until_ready(y_bf)
    assert y_bf.shape == x_bf.shape and y_bf.dtype == x_bf.dtype
    assert jnp.allclose(
        y_bf.astype(jnp.float32), _gelu_ref(x_bf).astype(jnp.float32),
        atol=2e-2, rtol=2e-2,
    )

    print("KERNEL_OK")
</pallas_src>

<mosaic_0001>
module attributes {stable_mosaic.version = 11 : i64} {
  func.func @_gelu_kernel(%arg0: i32, %arg1: memref<1x512xf32, #tpu.memory_space<vmem>>, %arg2: memref<1x512xf32, #tpu.memory_space<vmem>>) attributes {dimension_semantics = [#tpu.dimension_semantics<parallel>], iteration_bounds = array<i64: 1>, scalar_prefetch = 0 : i64, scratch_operands = 0 : i64, tpu.core_type = #tpu.core_type<tc>, window_params = [{transform_indices = @transform_0, window_bounds = array<i64: 1, 512>}, {transform_indices = @transform_1, window_bounds = array<i64: 1, 512>}]} {
    %c0 = arith.constant 0 : index
    %c0_0 = arith.constant 0 : index
    %0 = vector.load %arg1[%c0, %c0_0] : memref<1x512xf32, #tpu.memory_space<vmem>>, vector<1x512xf32>
    %1 = arith.mulf %0, %0 : vector<1x512xf32>
    %2 = arith.mulf %1, %0 : vector<1x512xf32>
    %cst = arith.constant 4.471500e-02 : f32
    %3 = vector.broadcast %cst : f32 to vector<1x512xf32>
    %4 = arith.mulf %3, %2 : vector<1x512xf32>
    %5 = arith.addf %0, %4 : vector<1x512xf32>
    %cst_1 = arith.constant 0.797884583 : f32
    %6 = vector.broadcast %cst_1 : f32 to vector<1x512xf32>
    %7 = arith.mulf %6, %5 : vector<1x512xf32>
    %cst_2 = arith.constant 5.000000e-01 : f32
    %8 = vector.broadcast %cst_2 : f32 to vector<1x512xf32>
    %9 = arith.mulf %8, %0 : vector<1x512xf32>
    %10 = math.tanh %7 : vector<1x512xf32>
    %cst_3 = arith.constant 1.000000e+00 : f32
    %11 = vector.broadcast %cst_3 : f32 to vector<1x512xf32>
    %12 = arith.addf %11, %10 : vector<1x512xf32>
    %13 = arith.mulf %9, %12 : vector<1x512xf32>
    %c0_4 = arith.constant 0 : index
    %c0_5 = arith.constant 0 : index
    %14 = vector.load %arg2[%c0_4, %c0_5] : memref<1x512xf32, #tpu.memory_space<vmem>>, vector<1x512xf32>
    tpu.vector_store %arg2[%c0_4, %c0_5], %13 {strides = array<i32>} : memref<1x512xf32, #tpu.memory_space<vmem>>, vector<1x512xf32>,
    return
  }
  func.func @transform_0(%arg0: i32) -> (i32, i32) {
    %c0_i32 = arith.constant 0 : i32
    %c0_i32_0 = arith.constant 0 : i32
    return %arg0, %c0_i32 : i32, i32
  }
  func.func @transform_1(%arg0: i32) -> (i32, i32) {
    %c0_i32 = arith.constant 0 : i32
    %c0_i32_0 = arith.constant 0 : i32
    return %arg0, %c0_i32 : i32, i32
  }
}

</mosaic_0001>

<bundles_post_ra>
// kernel: tpu_custom_call.1
= control target key start
LH: loop header
LB: loop body
LE: loop exit
PB: predicated region body
PF: predicated region fallthrough
CT: control target
= control target key end

     0   :  { %6 = vsyncpa [#allocation3], 0  ;;  %s139_s0 = inlined_call_operand.hbm [shape: f32[1,512], index: 0, kind: input, shape index: {}]   ;;  %s140_s1 = inlined_call_operand.hbm [shape: f32[1,512], index: 1, kind: output, shape index: {}]  }
   0x1   :  { %7 = vsyncpa [#allocation4], 0  ;;  %s103_s6 = smov [#allocation2]   ;;  %s55_s10 = scalar_lea.hbm %s139_s0, 64 }
   0x2   :  { %s14_s7 = sshll.u32 %s103_s6, 4  ;;  %p56_p0 = scmp.ne.s32.totalorder %s139_s0, %s55_s10  ;;  %s15_s7 = int_to_ptr.vmem [resolvable:$true] %s14_s7 }
   0x3   :  { %p59_p1 = scmp.lt.u32.totalorder %s55_s10, %s139_s0 }
   0x5   :  { %p61_p2 = pnand %p59_p1, %p56_p0 }
   0x7   :  { %64 = shalt.err (!%p61_p2)
}
   0x8   :  { %s65_s15 = scalar_lea.vmem %s15_s7, 64  ;;  %p70_p4 = scmp.lt.s32.totalorder %s15_s7, %s15_s7 }
   0x9   :  { %p66_p3 = scmp.ne.s32.totalorder %s15_s7, %s65_s15  ;;  %p71_p5 = scmp.lt.s32.totalorder %s65_s15, %s65_s15 }
   0xb   :  { %p72_p6 = por %p71_p5, %p70_p4 }
   0xd   :  { %p73_p7 = pnand %p72_p6, %p66_p3 }
   0xf   :  { %76 = shalt.err (!%p73_p7)
}
  0x10   :  { %17 = dma.hbm_to_vmem [thread:$0]  %s139_s0, 64, %s15_s7, [#allocation3]  }
  0x11   :  { %99 = dma.done.wait [#allocation3], 64  }
  0x12   :  { %100 = vsyncadd [#allocation3], 4294967232  ;;  %v21_v0 = vld [vmem:[#allocation2] sm:$0xf]  ;;  %v31_v6 = vlaneseq  ;;  %s104_s18 = smov [#allocation5]  }
  0x13   :  { %v22_v1 = vmul.f32 %v21_v0, %v21_v0  ;;  %v27_v7 = vmul.f32 0.5, %v21_v0  ;;  %s42_s19 = sshll.u32 %s104_s18, 4  ;;  %s43_s19 = int_to_ptr.vmem [resolvable:$true] %s42_s19 }
  0x14   :  { %vm33_vm0 = vcmp.lt.s32.totalorder %v31_v6, 512  ;;  %s77_s0 = scalar_lea.vmem %s43_s19, 64  ;;  %p82_p9 = scmp.lt.s32.totalorder %s43_s19, %s43_s19 }
  0x15   :  { %v23_v2 = vmul.f32 %v22_v1, %v21_v0  ;;  %p78_p8 = scmp.ne.s32.totalorder %s43_s19, %s77_s0  ;;  %p83_p10 = scmp.lt.s32.totalorder %s77_s0, %s77_s0 }
  0x17   :  { %v24_v3 = vmul.f32 0.044715, %v23_v2  ;;  %p84_p11 = por %p83_p10, %p82_p9 }
  0x19   :  { %v25_v4 = vadd.f32 %v24_v3, %v21_v0  ;;  %p85_p12 = pnand %p84_p11, %p78_p8 }
  0x1b   :  { %v26_v5 = vmul.f32 0.7978846, %v25_v4 }
  0x1d   :  { %53 = vtanh.f32 %v26_v5 }
  0x27   :  { %v54_v8 = vpop.eup %53 }
  0x28   :  { %v29_v9 = vadd.f32 1.0, %v54_v8 }
  0x2a   :  { %v30_v10 = vmul.f32 %v29_v9, %v27_v7 }
  0x2c   :  { %35 = vst.msk [vmem:[#allocation5] sm:$0xf] %vm33_vm0, %v30_v10 }
  0x2d   :  { %88 = shalt.err (!%p85_p12)
}
  0x2e   :  { %s89_s22 = scalar_lea.hbm %s140_s1, 64 }
  0x2f   :  { %p90_p13 = scmp.ne.s32.totalorder %s140_s1, %s89_s22  ;;  %p93_p0 = scmp.lt.u32.totalorder %s89_s22, %s140_s1 }
  0x31   :  { %p95_p1 = pnand %p93_p0, %p90_p13 }
  0x33   :  { %98 = shalt.err (!%p95_p1)
}
  0x34   :  { %45 = dma.vmem_to_hbm [thread:$0]  %s43_s19, 64, %s140_s1, [#allocation4]  }
  0x35   :  { %101 = dma.done.wait [#allocation4], 64  }
  0x36   :  { %102 = vsyncadd [#allocation4], 4294967232 }
  0x37   :  { %49 = vsyncpa [#allocation3], 1 }
  0x38   :  { %50 = vsyncpa [#allocation4], 1 }

</bundles_post_ra>
